<compile_context>
chip_gen: v6e
topology: v6e:2x2x1
jax: 0.10.0
libtpu: 0.0.40
codegen_flags: <defaults>
</compile_context>

<pallas_src>
import functools

import jax
import jax.numpy as jnp
from jax.experimental import pallas as pl
from jax.experimental.pallas import tpu as pltpu


def _h2nn_packed_kernel(in_ref, w_ref, out_ref):
    """Lane-dense fused step: out_packed = in_packed @ W_block (128x128)."""
    acc = jnp.dot(in_ref[...], w_ref[...], preferred_element_type=jnp.float32)
    out_ref[...] = acc.astype(out_ref.dtype)


def _spd_sqrtm(Q):
    """Matrix square root of a symmetric positive-definite matrix via eigh."""
    Qs = 0.5 * (Q + Q.T)                      # symmetrize for robustness
    w, V = jnp.linalg.eigh(Qs)
    return (V * jnp.sqrt(jnp.maximum(w, 0.0))) @ V.T


@functools.partial(jax.jit, static_argnames=("tm",))
def h2nn_forward(u, x, Q, Wcinv, S, C, *, tm=4096):
    """JAX/Pallas equivalent of H2NN.forward(u, x) -> (dx, y)."""
    nx = Q.shape[0]
    nu = u.shape[-1]
    ny = C.shape[0]
    batch = x.shape[0]
    dtype = x.dtype
    itemsize = jnp.dtype(dtype).itemsize

    # ---- parameter algebra (tiny matrices, plain-JAX glue) ----
    A = (-0.5 * Q + S) @ Wcinv                 # (nx, nx)
    H = jnp.eye(nx, nu, dtype=Q.dtype)         # fixed buffer in the torch module
    B = _spd_sqrtm(Q) @ H                      # (nx, nu)

    # ---- per-sample fused weight (F x F), F = padded feature slot ----
    F = max(nx + nu, nx + ny)
    F = 1 << (F - 1).bit_length()              # next power of two
    assert F <= 128 and 128 % F == 0, "per-sample slot must divide 128 lanes"
    PACK = 128 // F                            # samples per 128-lane row

    # in-slot  [ x(nx) | u(nu) | 0... ]  ->  out-slot [ dx(nx) | y(ny) | 0... ]
    W_small = jnp.zeros((F, F), dtype=jnp.float32)
    W_small = W_small.at[:nx, :nx].set(A.T)                # x -> dx
    W_small = W_small.at[:nx, nx:nx + ny].set(C.T)         # x -> y
    W_small = W_small.at[nx:nx + nu, :nx].set(B.T)         # u -> dx
    # Block-diagonal replication: one copy per sample slot in the 128 lanes.
    W_block = jnp.kron(jnp.eye(PACK, dtype=jnp.float32), W_small).astype(dtype)

    # ---- batch packing & tiling ----
    sub = max(8, 32 // itemsize)               # sublane multiple for this dtype
    rows_needed = pl.cdiv(batch, PACK)         # packed 128-lane rows required
    rows_aligned = ((rows_needed + sub - 1) // sub) * sub
    tm_eff = min(tm, rows_aligned)
    tm_eff = max(sub, (tm_eff // sub) * sub)   # keep tile sublane-aligned
    n_blocks = pl.cdiv(rows_aligned, tm_eff)
    padded_rows = n_blocks * tm_eff
    padded_batch = padded_rows * PACK

    # Fused lane-dense input slab [x | u | 0] (one small XLA concat+pad; in a
    # real pipeline produce this layout upstream to avoid the extra pass).
    fused = jnp.concatenate([x.astype(dtype), u.astype(dtype)], axis=-1)
    fused = jnp.pad(fused, ((0, padded_batch - batch), (0, F - (nx + nu))))
    in_packed = fused.reshape(padded_rows, PACK * F)        # free reshape

    cost = pl.CostEstimate(
        flops=2 * padded_rows * 128 * 128,
        transcendentals=0,
        bytes_accessed=(2 * padded_rows * 128 + 128 * 128) * itemsize,
    )

    out_packed = pl.pallas_call(
        _h2nn_packed_kernel,
        out_shape=jax.ShapeDtypeStruct((padded_rows, 128), dtype),
        grid_spec=pltpu.PrefetchScalarGridSpec(
            num_scalar_prefetch=0,
            grid=(n_blocks,),
            in_specs=[
                pl.BlockSpec((tm_eff, 128), lambda i: (i, 0)),   # packed batch tile
                pl.BlockSpec((128, 128), lambda i: (0, 0)),      # W_block (resident)
            ],
            out_specs=pl.BlockSpec((tm_eff, 128), lambda i: (i, 0)),
        ),
        compiler_params=pltpu.CompilerParams(
            dimension_semantics=("parallel",),
            vmem_limit_bytes=32 * 1024 * 1024,   # safe on v5e/v6e/v7x
        ),
        cost_estimate=cost,
    )(in_packed, W_block)

    out = out_packed.reshape(padded_batch, F)   # free reshape back
    dx = out[:batch, :nx]
    y = out[:batch, nx:nx + ny]
    return dx, y


def _reference_forward(u, x, Q, Wcinv, S, C):
    nx = Q.shape[0]
    nu = u.shape[-1]
    A = (-0.5 * Q + S) @ Wcinv
    H = jnp.eye(nx, nu, dtype=Q.dtype)
    B = _spd_sqrtm(Q) @ H
    dx = x @ A.T + u @ B.T
    y = x @ C.T
    return dx, y


if __name__ == "__main__":
    nx, nu, ny = 4, 2, 2
    batch = 100  # not a multiple of 16 -> exercises the packing/padding path

    key = jax.random.PRNGKey(0)
    kq, kw, ks, kc, ku, kx = jax.random.split(key, 6)

    # Synthetic parameters matching the geotorch constraints used by the module:
    #   Q, Wcinv positive definite; S skew-symmetric; C unconstrained.
    Rq = jax.random.normal(kq, (nx, nx), dtype=jnp.float32)
    Q = Rq @ Rq.T + nx * jnp.eye(nx, dtype=jnp.float32)
    Rw = jax.random.normal(kw, (nx, nx), dtype=jnp.float32)
    Wcinv = Rw @ Rw.T + nx * jnp.eye(nx, dtype=jnp.float32)
    Rs = jax.random.normal(ks, (nx, nx), dtype=jnp.float32)
    S = 0.5 * (Rs - Rs.T)
    C = jax.random.normal(kc, (ny, nx), dtype=jnp.float32)

    u = jax.random.normal(ku, (batch, nu), dtype=jnp.float32)
    x = jax.random.normal(kx, (batch, nx), dtype=jnp.float32)

    dx, y = h2nn_forward(u, x, Q, Wcinv, S, C)
    jax.block_until_ready((dx, y))

    dx_ref, y_ref = _reference_forward(u, x, Q, Wcinv, S, C)
    assert dx.shape == (batch, nx) and y.shape == (batch, ny)
    assert jnp.allclose(dx, dx_ref, atol=1e-4, rtol=1e-4)
    assert jnp.allclose(y, y_ref, atol=1e-4, rtol=1e-4)

    print("KERNEL_OK")
</pallas_src>

<mosaic_0001>
module attributes {stable_mosaic.version = 11 : i64} {
  func.func @_h2nn_packed_kernel(%arg0: i32, %arg1: memref<8x128xf32, #tpu.memory_space<vmem>>, %arg2: memref<128x128xf32, #tpu.memory_space<vmem>>, %arg3: memref<8x128xf32, #tpu.memory_space<vmem>>) attributes {dimension_semantics = [#tpu.dimension_semantics<parallel>], iteration_bounds = array<i64: 1>, scalar_prefetch = 0 : i64, scratch_operands = 0 : i64, tpu.core_type = #tpu.core_type<tc>, window_params = [{transform_indices = @transform_0, window_bounds = array<i64: 8, 128>}, {pipeline_mode = #tpu.pipeline_mode<synchronous>, transform_indices = @transform_1, window_bounds = array<i64: 128, 128>}, {transform_indices = @transform_2, window_bounds = array<i64: 8, 128>}]} {
    %c0 = arith.constant 0 : index
    %c0_0 = arith.constant 0 : index
    %0 = vector.load %arg1[%c0, %c0_0] : memref<8x128xf32, #tpu.memory_space<vmem>>, vector<8x128xf32>
    %c0_1 = arith.constant 0 : index
    %c0_2 = arith.constant 0 : index
    %1 = vector.load %arg2[%c0_1, %c0_2] : memref<128x128xf32, #tpu.memory_space<vmem>>, vector<128x128xf32>
    %cst = arith.constant dense<0.000000e+00> : vector<8x128xf32>
    %2 = tpu.matmul %0, %1, %cst {dimension_numbers = #tpu.dot_dimension_numbers<[1], [0], [0], [1], [0, 0, 1, 1], [], []>} : vector<8x128xf32>, vector<128x128xf32>, vector<8x128xf32> -> vector<8x128xf32>
    %c0_3 = arith.constant 0 : index
    %c0_4 = arith.constant 0 : index
    %3 = vector.load %arg3[%c0_3, %c0_4] : memref<8x128xf32, #tpu.memory_space<vmem>>, vector<8x128xf32>
    tpu.vector_store %arg3[%c0_3, %c0_4], %2 {strides = array<i32>} : memref<8x128xf32, #tpu.memory_space<vmem>>, vector<8x128xf32>,
    return
  }
  func.func @transform_0(%arg0: i32) -> (i32, i32) {
    %c0_i32 = arith.constant 0 : i32
    %c0_i32_0 = arith.constant 0 : i32
    return %arg0, %c0_i32 : i32, i32
  }
  func.func @transform_1(%arg0: i32) -> (i32, i32) {
    %c0_i32 = arith.constant 0 : i32
    %c0_i32_0 = arith.constant 0 : i32
    %c0_i32_1 = arith.constant 0 : i32
    return %c0_i32, %c0_i32_0 : i32, i32
  }
  func.func @transform_2(%arg0: i32) -> (i32, i32) {
    %c0_i32 = arith.constant 0 : i32
    %c0_i32_0 = arith.constant 0 : i32
    return %arg0, %c0_i32 : i32, i32
  }
}

</mosaic_0001>

<bundles_post_ra>
// kernel: custom-call.2
= control target key start
LH: loop header
LB: loop body
LE: loop exit
PB: predicated region body
PF: predicated region fallthrough
CT: control target
= control target key end

     0   :  { %v300_v3 = vlaneseq  ;;  %v1769_v5 = vmov 0.0   ;;  %s289_s17 = smov [#allocation22]  ;;  %s292_s18 = smov [#allocation23]  ;;  %s2051_s0 = inlined_call_operand.vmem [shape: f32[2,2], index: 0, kind: input, shape index: {}]   ;;  %s2052_s1 = inlined_call_operand.vmem [shape: f32[2,2], index: 1, kind: input, shape index: {}]   ;;  %s2053_s2 = inlined_call_operand.vmem [shape: f32[2,2], index: 2, kind: input, shape index: {}]   ;;  %s2054_s3 = inlined_call_operand.vmem [shape: f32[2,2], index: 3, kind: input, shape index: {}]   ;;  %s2055_s4 = inlined_call_operand.vmem [shape: f32[2], index: 4, kind: output, shape index: {0}]   ;;  %s2056_s5 = inlined_call_operand.vmem [shape: f32[2], index: 5, kind: output, shape index: {1}]   ;;  %s2057_s6 = inlined_call_operand.vmem [shape: f32[2,2], index: 6, kind: output, shape index: {2}]   ;;  %s2058_s7 = inlined_call_operand.vmem [shape: f32[2,2], index: 7, kind: output, shape index: {3}]   ;;  %s2059_s8 = inlined_call_operand.vmem [shape: f32[2,2], index: 8, kind: output, shape index: {4}]   ;;  %s2060_s9 = inlined_call_operand.vmem [shape: f32[2,2], index: 9, kind: output, shape index: {5}]  }
   0x1   :  { %v72_v0 = vld [vmem:[%s2051_s0] sm:$0x3]  ;;  %295 = vst [vmem:[#allocation12] sm:$0xff] %v1769_v5  ;;  %296 = vst [vmem:[#allocation14] sm:$0xff] %v1769_v5  ;;  %s299_s0 = smov [#allocation12]  ;;  %s1467_s19 = smov [#allocation20] }
   0x2   :  { %v135_v1 = vld [vmem:[%s2052_s1] sm:$0x3]  ;;  %73 = vst [vmem:[#allocation1] sm:$0x3] %v72_v0  ;;  %297 = vst [vmem:[#allocation16] sm:$0xff] %v1769_v5  ;;  %v1834_v6 = vand.u32 127, %v300_v3 }
   0x3   :  { %v198_v2 = vld [vmem:[%s2053_s2] sm:$0x3]  ;;  %136 = vst [vmem:[#allocation3] sm:$0x3] %v135_v1  ;;  %298 = vst [vmem:[#allocation18] sm:$0xff] %v1769_v5  ;;  %v1836_v7 = vshrl.u32 %v300_v3, 7 }
   0x4   :  { %199 = vst [vmem:[#allocation5] sm:$0x3] %v198_v2  ;;  %v261_v4 = vld [vmem:[%s2054_s3] sm:$0x3]  ;;  %v302_v6 = vmov %v1834_v6  ;;  %s312_s1 = smov [#allocation18]  ;;  %s283_s2 = smov [#allocation20] }
   0x5   :  { %262 = vst [vmem:[#allocation7] sm:$0x3] %v261_v4  ;;  %v305_v7 = vmov %v1836_v7  ;;  %v315_v6 = vmov %v1834_v6  ;;  %s286_s3 = smov [#allocation21]  ;;  %vm1471_vm2 = vcmp.lt.s32.totalorder %v1834_v6, 2  ;;  %s1484_s20 = smov [#allocation21] }
   0x6   :  { %v318_v7 = vmov %v1836_v7  ;;  %vm309_vm0 = vcmp.eq.s32.totalorder %v305_v7, %v302_v6  ;;  %s1501_s21 = smov [#allocation22]  ;;  %s1518_s22 = smov [#allocation23] }
   0x7   :  { %vm322_vm1 = vcmp.eq.s32.totalorder %v318_v7, %v315_v6  ;;  %v1463_v6 = vmov %v1834_v6  ;;  %v1466_v7 = vmov %v1836_v7 }
   0x8   :  { %v306_v12 = vld [vmem:[%s299_s0] sm:$0x3]  ;;  %vm1476_vm3 = vcmp.eq.s32.totalorder %v1466_v7, %v1463_v6  ;;  %v1514_v6 = vmov %v1834_v6  ;;  %v1483_v7 = vmov %v1836_v7 }
   0x9   :  { %v266_v8 = vld [vmem:[#allocation1] sm:$0x3]  ;;  %v310_v14 = vsel %vm309_vm0, 1.0, %v306_v12  ;;  %v1480_v6 = vmov %v1834_v6  ;;  %v1517_v7 = vmov %v1836_v7 }
   0xa   :  { %v271_v9 = vld [vmem:[#allocation3] sm:$0x3]  ;;  %267 = vst [vmem:[#allocation0] sm:$0x3] %v266_v8  ;;  %v319_v13 = vld [vmem:[%s312_s1] sm:$0x3]  ;;  %v1497_v6 = vmov %v1834_v6  ;;  %v1500_v7 = vmov %v1836_v7  ;;  %vm1527_vm4 = vcmp.eq.s32.totalorder %v1517_v7, %v1514_v6 }
   0xb   :  { %v276_v10 = vld [vmem:[#allocation5] sm:$0x3]  ;;  %272 = vst [vmem:[#allocation2] sm:$0x3] %v271_v9  ;;  %v323_v15 = vsel %vm322_vm1, 1.0, %v319_v13  ;;  %311 = vst [vmem:[%s299_s0] sm:$0x3] %v310_v14 }
   0xc   :  { %277 = vst [vmem:[#allocation4] sm:$0x3] %v276_v10  ;;  %v281_v11 = vld [vmem:[#allocation7] sm:$0x3]  ;;  %324 = vst [vmem:[%s312_s1] sm:$0x3] %v323_v15 }
   0xd   :  { %282 = vst [vmem:[#allocation6] sm:$0x3] %v281_v11 }
  0x11   :  { %v284_v16 = vld [vmem:[#allocation0] sm:$0xff] }
  0x12   :  { %v287_v17 = vld [vmem:[#allocation2] sm:$0xff]  ;;  %285 = vst [vmem:[%s283_s2] sm:$0xff] %v284_v16 }
  0x13   :  { %v290_v18 = vld [vmem:[#allocation4] sm:$0xff]  ;;  %288 = vst [vmem:[%s286_s3] sm:$0xff] %v287_v17 }
  0x14   :  { %291 = vst [vmem:[%s289_s17] sm:$0xff] %v290_v18  ;;  %v293_v19 = vld [vmem:[#allocation6] sm:$0xff] }
  0x15   :  { %294 = vst [vmem:[%s292_s18] sm:$0xff] %v293_v19 }
  0x19   :  { %v1473_v20 = vld [vmem:[%s1467_s19] sm:$0x3] }
  0x1a   :  { %v1490_v21 = vld [vmem:[%s1484_s20] sm:$0x3]  ;;  %v1474_v22 = vsel %vm1471_vm2, %v1473_v20, 0.0 }
  0x1b   :  { %v1491_v23 = vsel %vm1471_vm2, %v1490_v21, 0.0  ;;  %v1507_v24 = vld [vmem:[%s1501_s21] sm:$0x3]  ;;  %v1475_v26 = vmul.f32 %v1474_v22, %v1474_v22 }
  0x1c   :  { %v1524_v25 = vld [vmem:[%s1518_s22] sm:$0x3]  ;;  %v1492_v27 = vmul.f32 %v1491_v23, %v1491_v23  ;;  %v1508_v28 = vsel %vm1471_vm2, %v1507_v24, 0.0 }
  0x1d   :  { %v1525_v29 = vsel %vm1471_vm2, %v1524_v25, 0.0  ;;  %v1509_v30 = vmul.f32 %v1508_v28, %v1508_v28  ;;  %v1477_v33 = vsel %vm1476_vm3, 0.0, %v1475_v26 }
  0x1e   :  { %v1494_v31 = vadd.f32 %v1492_v27, %v1475_v26  ;;  %v1526_v32 = vmul.f32 %v1525_v29, %v1525_v29  ;;  %v1493_v34 = vadd.f32 %v1492_v27, %v1477_v33 }
  0x20   :  { %v1511_v35 = vadd.f32 %v1509_v30, %v1494_v31  ;;  %v1510_v36 = vadd.f32 %v1509_v30, %v1493_v34  ;;  %v1528_v37 = vsel %vm1527_vm4, 0.0, %v1526_v32 }
  0x22   :  { %v1530_v38 = vadd.f32 %v1526_v32, %v1511_v35  ;;  %v1529_v39 = vadd.f32 %v1528_v37, %v1510_v36 }
  0x24   :  { %1531 = vadd.xlane.f32.xlu0 %v1530_v38 }
  0x28   :  { %1539 = vadd.xlane.f32.xlu0 %v1529_v39 }
  0xad   :  { %v1532_v40 = vpop.xlane.xlu0 %1531 }
  0xae   :  { %v1533_v41 = vrot.slane %v1532_v40, 4 }
  0xb0   :  { %v1534_v42 = vadd.f32 %v1533_v41, %v1532_v40 }
  0xb1   :  { %v1540_v43 = vpop.xlane.xlu0 %1539 }
  0xb2   :  { %v1535_v44 = vrot.slane %v1534_v42, 2  ;;  %v1541_v45 = vrot.slane %v1540_v43, 4 }
  0xb4   :  { %v1542_v46 = vadd.f32 %v1541_v45, %v1540_v43  ;;  %v1536_v47 = vadd.f32 %v1535_v44, %v1534_v42 }
  0xb6   :  { %v1543_v48 = vrot.slane %v1542_v46, 2  ;;  %v1537_v50 = vrot.slane %v1536_v47, 1 }
  0xb8   :  { %v1544_v49 = vadd.f32 %v1543_v48, %v1542_v46  ;;  %v1538_v53 = vadd.f32 %v1537_v50, %v1536_v47 }
  0xba   :  { %v1545_v51 = vrot.slane %v1544_v49, 1 }
  0xbc   :  { %v1546_v52 = vadd.f32 %v1545_v51, %v1544_v49 }
  0xbe   :  { %1718 = vpush %v1546_v52 }
  0xbf   :  { %1720 = vpush %v1538_v53 }
  0xef   :  { %s1719_s23 = spop %1718 }
  0xf0   :  { %s1721_s24 = spop %1720 }
  0xf1   :  { %s1549_s25 = smul.f32 1e-10, %s1721_s24 }
  0xf3   :  { %p1550_p0 = scmp.le.f32.partialorder %s1719_s23, %s1549_s25 }
  0xf4   :  { %s1860_s26 = smov (!%p1550_p0), 0  }
  0xf5   :  { %1553 = sbr.rel (%p1550_p0) target bundleno = 927 (0x39f), region = 440 }
  0xfa LB: > { %s1865_s27 = smov 0   ;;  %s1763_s26 = sphi %s1860_s26, %s2061_s26  }
  0xfb LB: >> { %s429_s28 = smov [#allocation20]  ;;  %v433_v6 = vmov %v1834_v6  ;;  %v436_v7 = vmov %v1836_v7  ;;  %s449_s29 = smov [#allocation21]  ;;  %vm752_vm14 = vcmp.eq.s32.totalorder %v1836_v7, 0  ;;  %vm764_vm15 = vcmp.eq.s32.totalorder %v1836_v7, 1  ;;  %s1767_s27 = sphi %s1865_s27, %s428_s27  }
  0xfc   : >> { %v453_v6 = vmov %v1834_v6  ;;  %v456_v7 = vmov %v1836_v7  ;;  %v437_v54 = vld [vmem:[%s429_s28] sm:$0x3]  ;;  %vm440_vm5 = vcmp.eq.s32.totalorder %v436_v7, %v433_v6  ;;  %s469_s30 = smov [#allocation23]  ;;  %s430_s10 = smov [#allocation24] }
  0xfd   : >> { %vm460_vm6 = vcmp.eq.s32.totalorder %v456_v7, %v453_v6  ;;  %v473_v6 = vmov %v1834_v6  ;;  %v476_v7 = vmov %v1836_v7  ;;  %v441_v55 = vsel %vm440_vm5, %v437_v54, 0.0  ;;  %v457_v56 = vld [vmem:[%s449_s29] sm:$0x3]  ;;  %s450_s11 = smov [#allocation25]  ;;  %s470_s12 = smov [#allocation26] }
  0xfe   : >> { %vm480_vm7 = vcmp.eq.s32.totalorder %v476_v7, %v473_v6  ;;  %v442_v57 = vrot.slane %v441_v55, 4  ;;  %v461_v58 = vsel %vm460_vm6, %v457_v56, 0.0  ;;  %v477_v59 = vld [vmem:[%s469_s30] sm:$0x3]  ;;  %s493_s13 = smov [#allocation25]  ;;  %s491_s14 = smov [#allocation24]  ;;  %v542_v6 = vmov %v1834_v6 }
  0xff   : >> { %v462_v60 = vrot.slane %v461_v58, 4  ;;  %v481_v61 = vsel %vm480_vm7, %v477_v59, 0.0  ;;  %s495_s15 = smov [#allocation26]  ;;  %s530_s16 = smov [#allocation27]  ;;  %v545_v7 = vmov %v1836_v7  ;;  %v557_v6 = vmov %v1834_v6 }
 0x100   : >> { %v443_v62 = vadd.f32 %v442_v57, %v441_v55  ;;  %v482_v63 = vrot.slane %v481_v61, 4  ;;  %s532_s0 = smov [#allocation28]  ;;  %s489_s1 = smov [#allocation29]  ;;  %v560_v7 = vmov %v1836_v7  ;;  %vm547_vm12 = vcmp.eq.s32.totalorder %v545_v7, %v542_v6 }
 0x101   : >> { %v463_v0 = vadd.f32 %v462_v60, %v461_v58  ;;  %s490_s2 = smov [#allocation30]  ;;  %s534_s1 = smov %s489_s1  ;;  %vm562_vm13 = vcmp.eq.s32.totalorder %v560_v7, %v557_v6  ;;  %v655_v6 = vmov %v1834_v6  ;;  %v658_v7 = vmov %v1836_v7 }
 0x102   : >> { %v444_v1 = vrot.slane %v443_v62, 2  ;;  %v483_v2 = vadd.f32 %v482_v63, %v481_v61  ;;  %s536_s2 = smov %s490_s2  ;;  %s538_s3 = smov [#allocation29]  ;;  %v669_v6 = vmov %v1834_v6  ;;  %v672_v7 = vmov %v1836_v7 }
 0x103   : >> { %v464_v3 = vrot.slane %v463_v0, 2  ;;  %s553_s17 = smov [#allocation30]  ;;  %s551_s18 = smov [#allocation31]  ;;  %vm662_vm0 = vcmp.eq.s32.totalorder %v658_v7, %v655_v6  ;;  %v628_v6 = vmov %v1834_v6  ;;  %v631_v7 = vmov %v1836_v7 }
 0x104   : >> { %v445_v4 = vadd.f32 %v444_v1, %v443_v62  ;;  %v484_v5 = vrot.slane %v483_v2, 2  ;;  %s568_s19 = smov [#allocation31]  ;;  %s1880_s20 = smov [#allocation20]  ;;  %v642_v6 = vmov %v1834_v6  ;;  %v645_v7 = vmov %v1836_v7 }
 0x105   : >> { %v465_v8 = vadd.f32 %v464_v3, %v463_v0  ;;  %s566_s21 = smov [#allocation32]  ;;  %s1882_s22 = smov [#allocation21]  ;;  %v576_v53 = vld [vmem:[%s1880_s20] sm:$0x3]  ;;  %vm677_vm1 = vcmp.eq.s32.totalorder %v672_v7, %v669_v6  ;;  %vm636_vm3 = vcmp.eq.s32.totalorder %v631_v7, %v628_v6  ;;  %vm649_vm4 = vcmp.eq.s32.totalorder %v645_v7, %v642_v6 }
 0x106   : >> { %v446_v9 = vrot.slane %v445_v4, 1  ;;  %v485_v10 = vadd.f32 %v484_v5, %v483_v2  ;;  %s1884_s23 = smov [#allocation22]  ;;  %s1886_s24 = smov [#allocation23]  ;;  %v577_v54 = vld [vmem:[%s1882_s22] sm:$0x3]  ;;  %vm691_vm5 = vcmp.eq.s32.totalorder %v1834_v6, 0 }
 0x107   : >> { %v466_v11 = vrot.slane %v465_v8, 1  ;;  %s1888_s25 = smov [#allocation12]  ;;  %s1890_s28 = smov [#allocation14]  ;;  %v578_v55 = vld [vmem:[%s1884_s23] sm:$0x3]  ;;  %vm695_vm6 = vcmp.eq.s32.totalorder %v1834_v6, 1 }
 0x108   : >> { %v447_v12 = vadd.f32 %v446_v9, %v445_v4  ;;  %v486_v13 = vrot.slane %v485_v10, 1  ;;  %s1892_s29 = smov [#allocation16]  ;;  %s792_s30 = smov [#allocation31]  ;;  %v579_v56 = vld [vmem:[%s1886_s24] sm:$0x3] }
 0x109   : >> { %v467_v14 = vadd.f32 %v466_v11, %v465_v8  ;;  %v800_v57 = vld [vmem:[%s1888_s25] sm:$0x3]  ;;  %s428_s27 = sadd.s32 1, %s1767_s27  }
 0x10a   : >> { %448 = vst [vmem:[%s430_s10] sm:$0x1] %v447_v12  ;;  %v487_v15 = vadd.f32 %v486_v13, %v485_v10  ;;  %s1896_s10 = smov [#allocation18]  ;;  %v801_v58 = vld [vmem:[%s1890_s28] sm:$0x3]  ;;  %p425_p1 = scmp.ge.s32.totalorder %s428_s27, 3  }
 0x10b   : >> { %468 = vst [vmem:[%s450_s11] sm:$0x1] %v467_v14  ;;  %v802_v59 = vld [vmem:[%s1892_s29] sm:$0x3]  ;;  %s570_s11 = smov [#allocation32]  ;;  %v329_v6 = vmov (%p425_p1), %v1834_v6  ;;  %v332_v7 = vmov (%p425_p1), %v1836_v7 }
 0x10c   : >> { %488 = vst [vmem:[%s470_s12] sm:$0x1] %v487_v15  ;;  %v803_v61 = vld [vmem:[%s1896_s10] sm:$0x3]  ;;  %s794_s12 = smov [#allocation32]  ;;  %v382_v6 = vmov (%p425_p1), %v1834_v6  ;;  %vm344_vm7 = vcmp.eq.s32.totalorder (%p425_p1), %v332_v7, %v329_v6  ;;  %v385_v7 = vmov (%p425_p1), %v1836_v7 }
 0x10d   : > { %v348_v6 = vmov (%p425_p1), %v1834_v6  ;;  %v351_v7 = vmov (%p425_p1), %v1836_v7 }
 0x10e   : > { %v365_v6 = vmov (%p425_p1), %v1834_v6  ;;  %v368_v7 = vmov (%p425_p1), %v1836_v7 }
 0x111   : >> { %v492_v18 = vld [vmem:[%s491_s14] sm:$0xff]  ;;  %s598_s14 = smov [#allocation30] }
 0x112   : >> { %v494_v16 = vld [vmem:[%s493_s13] sm:$0xff]  ;;  %v515_v33 = vand.u32 2147483647, %v492_v18  ;;  %s596_s13 = smov [#allocation29] }
 0x113   : >> { %v498_v17 = vmul.f32 2.0, %v494_v16  ;;  %v496_v19 = vld [vmem:[%s495_s15] sm:$0xff]  ;;  %v516_v36 = vand.u32 2147483647, %v494_v16  ;;  %s1912_s15 = smov [#allocation12] }
 0x114   : >> { %v497_v20 = vsub.f32 %v496_v19, %v492_v18  ;;  %v517_v34 = vand.u32 2147483647, %v496_v19 }
 0x115   : >> { %1745 = vrcp.f32 %v498_v17 }
 0x116   : >> { %v518_v35 = vmin.f32 %v515_v33, %v517_v34 }
 0x118   : >> { %v519_v37 = vmul.f32 1.1920929e-08, %v518_v35 }
 0x11a   : >> { %vm520_vm11 = vcmp.le.f32.partialorder %v516_v36, %v519_v37 }
 0x122   : >> { %v1746_v21 = vpop.eup %1745 }
 0x123   : >> { %v500_v22 = vmul.f32 %v1746_v21, %v497_v20 }
 0x125   : >> { %v502_v23 = vmul.f32 %v500_v22, %v500_v22  ;;  %vm501_vm10 = vcmp.ge.f32.partialorder %v500_v22, 0.0 }
 0x127   : >> { %v503_v24 = vadd.f32 1.0, %v502_v23 }
 0x129   : >> { %1747 = vrsqrt.f32 %v503_v24  ;;  %vm506_vm8 = vcmp.eq.f32.partialorder %v503_v24, inf  ;;  %v509_v26 = vand.u32 2147483648, %v503_v24  ;;  %vm508_vm9 = vcmp.eq.f32.partialorder %v503_v24, 0.0 }
 0x136   : >> { %v1748_v25 = vpop.eup %1747 }
 0x137   : >> { %v505_v27 = vmul.f32 %v1748_v25, %v503_v24 }
 0x139   : >> { %v507_v28 = vsel %vm506_vm8, %v503_v24, %v505_v27  ;;  %vm397_vm8 = vcmp.eq.s32.totalorder (%p425_p1), %v385_v7, %v382_v6 }
 0x13a   : >> { %v510_v29 = vsel %vm508_vm9, %v509_v26, %v507_v28 }
 0x13b   : >> { %v511_v30 = vxor.u32 2147483648, %v510_v29 }
 0x13d   : >> { %v512_v31 = vsel %vm501_vm10, %v510_v29, %v511_v30 }
 0x13e   : >> { %v513_v32 = vadd.f32 %v512_v31, %v500_v22 }
 0x140   : >> { %1749 = vrcp.f32 %v513_v32 }
 0x14d   : >> { %v1750_v38 = vpop.eup %1749 }
 0x14e   : >> { %v521_v39 = vsel %vm520_vm11, 0.0, %v1750_v38 }
 0x14f   : >> { %v522_v40 = vmul.f32 %v521_v39, %v521_v39  ;;  %v526_v41 = vmul.f32 %v521_v39, %v494_v16 }
 0x151   : >> { %v523_v42 = vadd.f32 1.0, %v522_v40  ;;  %v527_v43 = vsub.f32 %v492_v18, %v526_v41  ;;  %v529_v44 = vadd.f32 %v526_v41, %v496_v19 }
 0x153   : >> { %1751 = vrsqrt.f32 %v523_v42  ;;  %531 = vst [vmem:[%s530_s16] sm:$0xff] %v527_v43  ;;  %533 = vst [vmem:[%s532_s0] sm:$0xff] %v529_v44  ;;  %s1914_s16 = smov [#allocation22]  ;;  %s1916_s0 = smov [#allocation23] }
 0x160   : >> { %v1752_v45 = vpop.eup %1751 }
 0x161   : >> { %535 = vst [vmem:[%s534_s1] sm:$0xff] %v1752_v45  ;;  %v525_v46 = vmul.f32 %v1752_v45, %v521_v39  ;;  %s1918_s1 = smov [#allocation20] }
 0x163   : >> { %537 = vst [vmem:[%s536_s2] sm:$0xff] %v525_v46  ;;  %s1920_s2 = smov [#allocation16] }
 0x168   : >> { %v539_v47 = vld [vmem:[%s538_s3] ss:$0 sm:$0xff]  ;;  %s1922_s3 = smov [#allocation14] }
 0x169   : >> { %v548_v48 = vsel %vm547_vm12, %v539_v47, 0.0  ;;  %v597_v27 = vld [vmem:[%s596_s13] ss:$0 sm:$0xff]  ;;  %s768_s13 = smov [#allocation21] }
 0x16a   : >> { %549 = vadd.xlane.f32.xlu0 %v548_v48  ;;  %v554_v49 = vld [vmem:[%s553_s17] ss:$0 sm:$0xff]  ;;  %s1926_s17 = smov [#allocation18] }
 0x16b   : >> { %v563_v50 = vsel %vm562_vm13, %v554_v49, 0.0  ;;  %v599_v28 = vld [vmem:[%s598_s14] ss:$0 sm:$0xff]  ;;  %s745_s14 = smov [#allocation22] }
 0x16e   : >> { %564 = vadd.xlane.f32.xlu0 %v563_v50 }
 0x1f3   : >> { %v550_v51 = vpop.xlane.xlu0 %549 }
 0x1f4   : >> { %552 = vst [vmem:[%s551_s18] sm:$0xff] %v550_v51  ;;  %s1928_s18 = smov [#allocation21] }
 0x1f7   : >> { %v565_v52 = vpop.xlane.xlu0 %564 }
 0x1f8   : >> { %567 = vst [vmem:[%s566_s21] sm:$0xff] %v565_v52  ;;  %s665_s21 = smov [#allocation23] }
 0x1fb   : >> { %v569_v60 = vld [vmem:[%s568_s19] sm:$0xff]  ;;  %s666_s19 = smov [#allocation28] }
 0x1fc   : >> { %v793_v62 = vld [vmem:[%s792_s30] sm:$0xff]  ;;  %v580_v63 = vmul.f32 %v576_v53, %v569_v60  ;;  %v583_v0 = vmul.f32 %v577_v54, %v569_v60  ;;  %v587_v1 = vmul.f32 %v578_v55, %v569_v60  ;;  %v590_v2 = vmul.f32 %v579_v56, %v569_v60  ;;  %s681_s30 = smov [#allocation21] }
 0x1fd   : >> { %v804_v3 = vmul.f32 %v800_v57, %v793_v62  ;;  %v807_v4 = vmul.f32 %v801_v58, %v793_v62  ;;  %v811_v5 = vmul.f32 %v802_v59, %v793_v62  ;;  %v814_v8 = vmul.f32 %v803_v61, %v793_v62 }
 0x1ff   : >> { %v571_v9 = vld [vmem:[%s570_s11] sm:$0xff]  ;;  %s1973_s11 = smov [#allocation23] }
 0x200   : >> { %v795_v10 = vld [vmem:[%s794_s12] sm:$0xff]  ;;  %v581_v11 = vmul.f32 %v578_v55, %v571_v9  ;;  %v584_v12 = vmul.f32 %v579_v56, %v571_v9  ;;  %v586_v13 = vmul.f32 %v576_v53, %v571_v9  ;;  %v589_v14 = vmul.f32 %v577_v54, %v571_v9  ;;  %s744_s12 = smov [#allocation20] }
 0x201   : >> { %v805_v15 = vmul.f32 %v802_v59, %v795_v10  ;;  %v808_v16 = vmul.f32 %v803_v61, %v795_v10  ;;  %v810_v17 = vmul.f32 %v800_v57, %v795_v10  ;;  %v813_v18 = vmul.f32 %v801_v58, %v795_v10  ;;  %v673_v59 = vld [vmem:[%s666_s19] ss:$0 sm:$0xff] }
 0x202   : >> { %v582_v19 = vsub.f32 %v580_v63, %v581_v11  ;;  %v585_v20 = vsub.f32 %v583_v0, %v584_v12  ;;  %v588_v21 = vadd.f32 %v587_v1, %v586_v13  ;;  %v591_v22 = vadd.f32 %v590_v2, %v589_v14 }
 0x203   : >> { %v806_v23 = vsub.f32 %v804_v3, %v805_v15  ;;  %v809_v24 = vsub.f32 %v807_v4, %v808_v16  ;;  %v812_v25 = vadd.f32 %v811_v5, %v810_v17  ;;  %v815_v26 = vadd.f32 %v814_v8, %v813_v18 }
 0x204   : >> { %593 = vst [vmem:[%s1882_s22] sm:$0x3] %v585_v20  ;;  %595 = vst [vmem:[%s1886_s24] sm:$0x3] %v591_v22  ;;  %s625_s22 = smov [#allocation27]  ;;  %s639_s24 = smov [#allocation21] }
 0x205   : >> { %592 = vst [vmem:[%s1880_s20] sm:$0x3] %v582_v19  ;;  %594 = vst [vmem:[%s1884_s23] sm:$0x3] %v588_v21  ;;  %s652_s20 = smov [#allocation22]  ;;  %s624_s23 = smov [#allocation20]  ;;  %v632_v63 = vld [vmem:[%s625_s22] ss:$0 sm:$0xff] }
 0x206   : >> { %816 = vst [vmem:[%s1888_s25] sm:$0x3] %v806_v23  ;;  %817 = vst [vmem:[%s1890_s28] sm:$0x3] %v809_v24  ;;  %s1970_s25 = smov [#allocation22]  ;;  %s1770_s28 = smov 1  }
 0x207   : >> { %818 = vst [vmem:[%s1892_s29] sm:$0x3] %v812_v25  ;;  %819 = vst [vmem:[%s1896_s10] sm:$0x3] %v815_v26  ;;  %s680_s29 = smov [#allocation20]  ;;  %s1771_s10 = smov 127  }
 0x20b   : >> { %v607_v30 = vld [vmem:[%s1916_s0] sm:$0x3] }
 0x20c   : >> { %v606_v29 = vld [vmem:[%s1914_s16] sm:$0x3]  ;;  %v615_v36 = vmul.f32 %v607_v30, %v599_v28  ;;  %v618_v42 = vmul.f32 %v607_v30, %v597_v27 }
 0x20d   : >> { %v604_v31 = vld [vmem:[%s1918_s1] sm:$0x3]  ;;  %v614_v35 = vmul.f32 %v606_v29, %v597_v27  ;;  %v617_v37 = vmul.f32 %v606_v29, %v599_v28 }
 0x20e   : >> { %v822_v32 = vld [vmem:[%s1912_s15] ss:$0 sm:$0xff]  ;;  %v1693_v34 = vld [vmem:[%s1912_s15 + $0x1] ss:$0 sm:$0xff]  ;;  %v608_v48 = vmul.f32 %v604_v31, %v597_v27  ;;  %v611_v49 = vmul.f32 %v604_v31, %v599_v28 }
 0x20f   : >> { %v1692_v33 = vld [vmem:[%s1912_s15 - $0x1] sm:$0x2]  ;;  %v1695_v40 = vld [vmem:[%s1920_s2 + $0x1] sm:$0x1]  ;;  %v616_v47 = vsub.f32 %v614_v35, %v615_v36  ;;  %v619_v53 = vadd.f32 %v618_v42, %v617_v37 }
 0x210   : >> { %v829_v38 = vsel %vm752_vm14, %v822_v32, %v1692_v33  ;;  %v833_v39 = vld [vmem:[%s1920_s2] ss:$0 sm:$0xff]  ;;  %v841_v43 = vsel %vm764_vm15, %v1693_v34, %v1695_v40  ;;  %v1697_v45 = vld [vmem:[%s1922_s3 + $0x1] ss:$0 sm:$0xff] }
 0x211   : >> { %v846_v41 = vld [vmem:[%s1922_s3] ss:$0 sm:$0xff]  ;;  %832 = vst [vmem:[%s1912_s15] sm:$0x3] %v829_v38  ;;  %843 = vst [vmem:[%s1920_s2] sm:$0x3] %v841_v43  ;;  %v1699_v51 = vld [vmem:[%s1926_s17 + $0x1] sm:$0x1] }
 0x212   : >> { %v1696_v44 = vld [vmem:[%s1922_s3 - $0x1] sm:$0x2]  ;;  %1694 = vst [vmem:[%s1912_s15 + $0x1] sm:$0x1] %v833_v39  ;;  %v865_v54 = vsel %vm764_vm15, %v1697_v45, %v1699_v51  ;;  %622 = vst [vmem:[%s1914_s16] sm:$0x3] %v616_v47  ;;  %s769_s15 = smov [#allocation23] }
 0x213   : >> { %v857_v46 = vld [vmem:[%s1926_s17] ss:$0 sm:$0xff]  ;;  %v853_v50 = vsel %vm752_vm14, %v846_v41, %v1696_v44  ;;  %623 = vst [vmem:[%s1916_s0] sm:$0x3] %v619_v53  ;;  %s868_s16 = sadd.s32 (%p425_p1), 1, %s1763_s26   ;;  %s333_s0 = smov (%p425_p1), [#allocation20] }
 0x214   : >> { %v605_v52 = vld [vmem:[%s1928_s18] sm:$0x3]  ;;  %856 = vst [vmem:[%s1922_s3] sm:$0x3] %v853_v50  ;;  %867 = vst [vmem:[%s1926_s17] sm:$0x3] %v865_v54  ;;  %s369_s2 = smov (%p425_p1), [#allocation22]  ;;  %p421_p2 = scmp.ge.s32.totalorder (%p425_p1), %s868_s16, 15 }
 0x215   : >> { %v609_v55 = vmul.f32 %v605_v52, %v599_v28  ;;  %v612_v56 = vmul.f32 %v605_v52, %v597_v27  ;;  %1698 = vst [vmem:[%s1922_s3 + $0x1] sm:$0x1] %v857_v46  ;;  %s386_s3 = smov (%p425_p1), [#allocation23]  ;;  %s2061_s26 = smov (%p425_p1), %s868_s16 }
 0x217   : >> { %v610_v57 = vsub.f32 %v608_v48, %v609_v55  ;;  %v613_v58 = vadd.f32 %v612_v56, %v611_v49 }
 0x219   : >> { %620 = vst [vmem:[%s1918_s1] sm:$0x3] %v610_v57  ;;  %621 = vst [vmem:[%s1928_s18] sm:$0x3] %v613_v58  ;;  %v659_v60 = vld [vmem:[%s652_s20] sm:$0x3]  ;;  %s352_s1 = smov (%p425_p1), [#allocation21] }
 0x21a   : >> { %v663_v61 = vsel %vm662_vm0, 0.0, %v659_v60  ;;  %v674_v62 = vld [vmem:[%s665_s21] sm:$0x3] }
 0x21b   : >> { %664 = vst [vmem:[%s652_s20] sm:$0x3] %v663_v61  ;;  %v678_v0 = vsel %vm677_vm1, %v673_v59, %v674_v62 }
 0x21c   : >> { %679 = vst [vmem:[%s665_s21] sm:$0x3] %v678_v0 }
 0x220   : >> { %v633_v1 = vld [vmem:[%s624_s23] sm:$0x3] }
 0x221   : >> { %v646_v2 = vld [vmem:[%s639_s24] sm:$0x3]  ;;  %v637_v3 = vsel %vm636_vm3, %v632_v63, %v633_v1 }
 0x222   : >> { %v650_v4 = vsel %vm649_vm4, 0.0, %v646_v2  ;;  %638 = vst [vmem:[%s624_s23] sm:$0x3] %v637_v3  ;;  %v718_v5 = vld [vmem:[%s1970_s25] sm:$0x3] }
 0x223   : >> { %651 = vst [vmem:[%s639_s24] sm:$0x3] %v650_v4  ;;  %719 = vrot.lane.b32.xlu0 %v718_v5, %s1770_s28  ;;  %v714_v11 = vld [vmem:[%s1973_s11] sm:$0x3] }
 0x224   : >> { %v735_v12 = vld [vmem:[%s1973_s11] sm:$0x3] }
 0x225   : >> { %v717_v30 = vld [vmem:[%s1970_s25] sm:$0x3] }
 0x229   : >> { %v686_v8 = vld [vmem:[%s680_s29] sm:$0x3] }
 0x22a   : >> { %687 = vrot.lane.b32.xlu1 %v686_v8, %s1770_s28  ;;  %v682_v9 = vld [vmem:[%s681_s30] sm:$0x3] }
 0x22b   : >> { %v703_v10 = vld [vmem:[%s681_s30] sm:$0x3] }
 0x22c   : >> { %v685_v18 = vld [vmem:[%s680_s29] sm:$0x3] }
 0x22e   : >> { %683 = vrot.lane.b32.xlu1 %v682_v9, %s1770_s28 }
 0x232   : >> { %704 = vrot.lane.b32.xlu1 %v703_v10, %s1771_s10 }
 0x236   : >> { %715 = vrot.lane.b32.xlu1 %v714_v11, %s1770_s28 }
 0x23a   : >> { %736 = vrot.lane.b32.xlu1 %v735_v12, %s1771_s10 }
 0x295   : >> { %v720_v20 = vpop.permute.xlu0 %719 }
 0x296   : >> { %v724_v22 = vsel %vm691_vm5, %v718_v5, %v720_v20 }
 0x29c   : >> { %v688_v13 = vpop.permute.xlu1 %687 }
 0x29d   : >> { %v692_v14 = vsel %vm691_vm5, %v686_v8, %v688_v13 }
 0x2a0   : >> { %v684_v15 = vpop.permute.xlu1 %683 }
 0x2a1   : >> { %v696_v16 = vsel %vm695_vm6, %v684_v15, %v692_v14 }
 0x2a2   : >> { %v702_v17 = vsel %vm1471_vm2, %v696_v16, 0.0 }
 0x2a3   : >> { %710 = vst [vmem:[%s680_s29] sm:$0x3] %v702_v17 }
 0x2a4   : >> { %v705_v19 = vpop.permute.xlu1 %704 }
 0x2a5   : >> { %v709_v21 = vsel %vm695_vm6, %v685_v18, %v705_v19 }
 0x2a6   : >> { %711 = vst [vmem:[%s681_s30] sm:$0x3] %v709_v21 }
 0x2a8   : >> { %v716_v23 = vpop.permute.xlu1 %715 }
 0x2a9   : >> { %v728_v24 = vsel %vm695_vm6, %v716_v23, %v724_v22 }
 0x2aa   : >> { %v746_v25 = vld [vmem:[%s744_s12] ss:$0 sm:$0xff]  ;;  %v1685_v27 = vld [vmem:[%s744_s12 + $0x1] ss:$0 sm:$0xff]  ;;  %v734_v29 = vsel %vm1471_vm2, %v728_v24, 0.0 }
 0x2ab   : >> { %v1684_v26 = vld [vmem:[%s744_s12 - $0x1] sm:$0x2]  ;;  %742 = vst [vmem:[%s1970_s25] sm:$0x3] %v734_v29 }
 0x2ac   : >> { %v753_v28 = vsel %vm752_vm14, %v746_v25, %v1684_v26  ;;  %v737_v31 = vpop.permute.xlu1 %736 }
 0x2ad   : >> { %756 = vst [vmem:[%s744_s12] sm:$0x3] %v753_v28  ;;  %v770_v32 = vld [vmem:[%s768_s13] ss:$0 sm:$0xff]  ;;  %v1689_v34 = vld [vmem:[%s768_s13 + $0x1] ss:$0 sm:$0xff]  ;;  %v741_v35 = vsel %vm695_vm6, %v717_v30, %v737_v31 }
 0x2ae   : >> { %v1688_v33 = vld [vmem:[%s768_s13 - $0x1] sm:$0x2]  ;;  %743 = vst [vmem:[%s1973_s11] sm:$0x3] %v741_v35 }
 0x2af   : >> { %v777_v36 = vsel %vm752_vm14, %v770_v32, %v1688_v33 }
 0x2b0   : >> { %780 = vst [vmem:[%s768_s13] sm:$0x3] %v777_v36 }
 0x2b2   : >> { %v757_v37 = vld [vmem:[%s745_s14] ss:$0 sm:$0xff]  ;;  %v1687_v38 = vld [vmem:[%s745_s14 + $0x1] sm:$0x1] }
 0x2b3   : >> { %1686 = vst [vmem:[%s744_s12 + $0x1] sm:$0x1] %v757_v37  ;;  %v765_v39 = vsel %vm764_vm15, %v1685_v27, %v1687_v38 }
 0x2b4   : >> { %767 = vst [vmem:[%s745_s14] sm:$0x3] %v765_v39 }
 0x2b5   : >> { %v781_v40 = vld [vmem:[%s769_s15] ss:$0 sm:$0xff]  ;;  %v1691_v41 = vld [vmem:[%s769_s15 + $0x1] sm:$0x1] }
 0x2b6   : >> { %1690 = vst [vmem:[%s768_s13 + $0x1] sm:$0x1] %v781_v40  ;;  %v789_v42 = vsel %vm764_vm15, %v1689_v34, %v1691_v41 }
 0x2b7   : >> { %791 = vst [vmem:[%s769_s15] sm:$0x3] %v789_v42  ;;  %427 = sbr.rel (!%p425_p1) target bundleno = 251 (0xfb), region = 435 }
 0x2ba   : > { %v339_v43 = vld [vmem:[%s333_s0] sm:$0x3] (%p425_p1) }
 0x2bb   : > { %v340_v45 = vsel (%p425_p1), %vm1471_vm2, %v339_v43, 0.0  ;;  %v375_v47 = vld [vmem:[%s369_s2] sm:$0x3] (%p425_p1) }
 0x2bc   : > { %v341_v49 = vmul.f32 %v340_v45, %v340_v45  ;;  %v376_v51 = vsel %vm1471_vm2, %v375_v47, 0.0 }
 0x2bd   : > { %v358_v44 = vld [vmem:[%s352_s1] sm:$0x3]  ;;  %v377_v53 = vmul.f32 %v376_v51, %v376_v51 }
 0x2be   : > { %v359_v46 = vsel %vm1471_vm2, %v358_v44, 0.0  ;;  %v392_v48 = vld [vmem:[%s386_s3] sm:$0x3]  ;;  %v345_v56 = vsel %vm344_vm7, 0.0, %v341_v49 }
 0x2bf   : > { %v360_v50 = vmul.f32 %v359_v46, %v359_v46  ;;  %v393_v52 = vsel %vm1471_vm2, %v392_v48, 0.0 }
 0x2c0   : > { %v394_v55 = vmul.f32 %v393_v52, %v393_v52 }
 0x2c1   : > { %v362_v54 = vadd.f32 %v360_v50, %v341_v49  ;;  %v361_v57 = vadd.f32 %v360_v50, %v345_v56 }
 0x2c2   : > { %v398_v60 = vsel %vm397_vm8, 0.0, %v394_v55 }
 0x2c3   : > { %v379_v58 = vadd.f32 %v377_v53, %v362_v54  ;;  %v378_v59 = vadd.f32 %v377_v53, %v361_v57 }
 0x2c5   : > { %v400_v61 = vadd.f32 %v394_v55, %v379_v58  ;;  %v399_v62 = vadd.f32 %v398_v60, %v378_v59 }
 0x2c7   : > { %401 = vadd.xlane.f32.xlu0 %v400_v61 }
 0x2cb   : > { %409 = vadd.xlane.f32.xlu0 %v399_v62 }
 0x350   : > { %v402_v63 = vpop.xlane.xlu0 %401 }
 0x351   : > { %v403_v0 = vrot.slane %v402_v63, 4 }
 0x353   : > { %v404_v1 = vadd.f32 %v403_v0, %v402_v63 }
 0x354   : > { %v410_v2 = vpop.xlane.xlu0 %409 }
 0x355   : > { %v405_v3 = vrot.slane %v404_v1, 2  ;;  %v411_v4 = vrot.slane %v410_v2, 4 }
 0x357   : > { %v412_v5 = vadd.f32 %v411_v4, %v410_v2  ;;  %v406_v8 = vadd.f32 %v405_v3, %v404_v1 }
 0x359   : > { %v413_v9 = vrot.slane %v412_v5, 2  ;;  %v407_v11 = vrot.slane %v406_v8, 1 }
 0x35b   : > { %v414_v10 = vadd.f32 %v413_v9, %v412_v5  ;;  %v408_v14 = vadd.f32 %v407_v11, %v406_v8 }
 0x35d   : > { %v415_v12 = vrot.slane %v414_v10, 1 }
 0x35f   : > { %v416_v13 = vadd.f32 %v415_v12, %v414_v10 }
 0x361   : > { %1722 = vpush %v416_v13 }
 0x362   : > { %1724 = vpush %v408_v14 }
 0x392   : > { %s1723_s27 = spop %1722 }
 0x393   : > { %s1725_s17 = spop %1724 }
 0x394   : > { %s419_s18 = smul.f32 1e-10, %s1725_s17 }
 0x396   : > { %p420_p3 = scmp.le.f32.partialorder %s1723_s27, %s419_s18 }
 0x398   : > { %p422_p4 = por %p421_p2, %p420_p3 }
 0x39a   :  { %870 = sbr.rel (!%p422_p4) target bundleno = 250 (0xfa), region = 446 }
 0x39f PF:  { %s871_s19 = smov [#allocation20]  ;;  %v875_v6 = vmov %v1834_v6  ;;  %v878_v7 = vmov %v1836_v7  ;;  %v931_v15 = vld [vmem:[#allocation12] sm:$0x3]  ;;  %v939_v16 = vld [vmem:[#allocation14] sm:$0x3]  ;;  %s891_s20 = smov [#allocation23] }
 0x3a0   :  { %v895_v6 = vmov %v1834_v6  ;;  %v898_v7 = vmov %v1836_v7  ;;  %v879_v17 = vld [vmem:[%s871_s19] sm:$0x3]  ;;  %vm882_vm9 = vcmp.eq.s32.totalorder %v878_v7, %v875_v6  ;;  %934 = vst [vmem:[#allocation13] sm:$0x3] %v931_v15  ;;  %942 = vst [vmem:[#allocation15] sm:$0x3] %v939_v16 }
 0x3a1   :  { %vm902_vm10 = vcmp.eq.s32.totalorder %v898_v7, %v895_v6  ;;  %v947_v18 = vld [vmem:[#allocation16] sm:$0x3]  ;;  %v883_v19 = vsel %vm882_vm9, %v879_v17, 0.0  ;;  %v899_v20 = vld [vmem:[%s891_s20] sm:$0x3]  ;;  %s872_s30 = smov [#allocation8] }
 0x3a2   :  { %950 = vst [vmem:[#allocation17] sm:$0x3] %v947_v18  ;;  %v955_v21 = vld [vmem:[#allocation18] sm:$0x3]  ;;  %v884_v22 = vrot.slane %v883_v19, 4  ;;  %v903_v23 = vsel %vm902_vm10, %v899_v20, 0.0 }
 0x3a3   :  { %958 = vst [vmem:[#allocation19] sm:$0x3] %v955_v21  ;;  %v904_v24 = vrot.slane %v903_v23, 4 }
 0x3a4   :  { %v885_v25 = vadd.f32 %v884_v22, %v883_v19 }
 0x3a5   :  { %v905_v26 = vadd.f32 %v904_v24, %v903_v23 }
 0x3a6   :  { %v886_v27 = vrot.slane %v885_v25, 2 }
 0x3a7   :  { %v906_v28 = vrot.slane %v905_v26, 2  ;;  %v1150_v29 = vld [vmem:[#allocation13] sm:$0x3]  ;;  %v1213_v30 = vld [vmem:[#allocation15] sm:$0x3] }
 0x3a8   :  { %v887_v31 = vadd.f32 %v886_v27, %v885_v25  ;;  %1151 = vst [vmem:[%s2057_s6] sm:$0x3] %v1150_v29  ;;  %1214 = vst [vmem:[%s2058_s7] sm:$0x3] %v1213_v30  ;;  %s892_s6 = smov [#allocation10] }
 0x3a9   :  { %v1276_v6 = vld [vmem:[#allocation17] sm:$0x3]  ;;  %v907_v7 = vadd.f32 %v906_v28, %v905_v26 }
 0x3aa   :  { %1277 = vst [vmem:[%s2059_s8] sm:$0x3] %v1276_v6  ;;  %v1339_v32 = vld [vmem:[#allocation19] sm:$0x3]  ;;  %v888_v33 = vrot.slane %v887_v31, 1 }
 0x3ab   :  { %1340 = vst [vmem:[%s2060_s9] sm:$0x3] %v1339_v32  ;;  %v908_v34 = vrot.slane %v907_v7, 1 }
 0x3ac   :  { %v889_v35 = vadd.f32 %v888_v33, %v887_v31 }
 0x3ad   :  { %v909_v36 = vadd.f32 %v908_v34, %v907_v7 }
 0x3ae   :  { %890 = vst [vmem:[%s872_s30] sm:$0x1] %v889_v35 }
 0x3af   :  { %910 = vst [vmem:[%s892_s6] sm:$0x1] %v909_v36 }
 0x3b5   :  { %v915_v37 = vld [vmem:[#allocation8] sm:$0x1] }
 0x3b6   :  { %918 = vst [vmem:[#allocation9] sm:$0x1] %v915_v37  ;;  %v923_v38 = vld [vmem:[#allocation10] sm:$0x1] }
 0x3b7   :  { %926 = vst [vmem:[#allocation11] sm:$0x1] %v923_v38 }
 0x3bd   :  { %v1022_v39 = vld [vmem:[#allocation9] sm:$0x1] }
 0x3be   :  { %1023 = vst [vmem:[%s2055_s4] sm:$0x1] %v1022_v39  ;;  %v1087_v40 = vld [vmem:[#allocation11] sm:$0x1] }
 0x3bf   :  { %1088 = vst [vmem:[%s2056_s5] sm:$0x1] %v1087_v40 }

// kernel: h2nn_forward.1
= control target key start
LH: loop header
LB: loop body
LE: loop exit
PB: predicated region body
PF: predicated region fallthrough
CT: control target
= control target key end

     0   :  { %v157_v0 = vmov 0.0   ;;  %vm158_vm0 = vmmov 0   ;;  %s228_s1 = inlined_call_operand.vmem [shape: f32[128,128], index: 1, kind: input, shape index: {}]   ;;  %s229_s0 = inlined_call_operand.vmem [shape: f32[8,128], index: 0, kind: input, shape index: {}]   ;;  %s230_s2 = inlined_call_operand.vmem [shape: f32[8,128], index: 2, kind: output, shape index: {}]  }
   0x1   :  { %120 = vmatprep.subr.mxu0 %v157_v0  ;;  %v27_v1 = vld [vmem:[%s228_s1 + $0x78] sm:$0xff]  ;;  %v26_v2 = vld [vmem:[%s228_s1 + $0x70] sm:$0xff]  ;;  %152 = vmatprep.mubr.msk.f32.mxu0 %vm158_vm0, %v157_v0  ;;  %v25_v3 = vld [vmem:[%s228_s1 + $0x68] sm:$0xff] }
   0x2   :  { %121 = vmatpush3.msra.mxu0 %v27_v1  ;;  %v24_v4 = vld [vmem:[%s228_s1 + $0x60] sm:$0xff]  ;;  %v23_v5 = vld [vmem:[%s228_s1 + $0x58] sm:$0xff]  ;;  %v22_v6 = vld [vmem:[%s228_s1 + $0x50] sm:$0xff] }
   0x3   :  { %122 = vmatprep.subr.mxu0 %v157_v0  ;;  %v21_v7 = vld [vmem:[%s228_s1 + $0x48] sm:$0xff]  ;;  %v20_v8 = vld [vmem:[%s228_s1 + $0x40] sm:$0xff]  ;;  %v19_v9 = vld [vmem:[%s228_s1 + $0x38] sm:$0xff] }
   0x4   :  { %123 = vmatpush3.msra.mxu0 %v26_v2  ;;  %v18_v10 = vld [vmem:[%s228_s1 + $0x30] sm:$0xff]  ;;  %v17_v11 = vld [vmem:[%s228_s1 + $0x28] sm:$0xff]  ;;  %v16_v12 = vld [vmem:[%s228_s1 + $0x20] sm:$0xff] }
   0x5   :  { %124 = vmatprep.subr.mxu0 %v157_v0  ;;  %v15_v13 = vld [vmem:[%s228_s1 + $0x18] sm:$0xff]  ;;  %v14_v14 = vld [vmem:[%s228_s1 + $0x10] sm:$0xff]  ;;  %v13_v15 = vld [vmem:[%s228_s1 + $0x8] sm:$0xff] }
   0x6   :  { %125 = vmatpush3.msra.mxu0 %v25_v3  ;;  %v12_v16 = vld [vmem:[%s228_s1] sm:$0xff] }
   0x7   :  { %126 = vmatprep.subr.mxu0 %v157_v0  ;;  %v11_v17 = vld [vmem:[%s229_s0] sm:$0xff] }
   0x8   :  { %127 = vmatpush3.msra.mxu0 %v24_v4 }
   0x9   :  { %128 = vmatprep.subr.mxu0 %v157_v0 }
   0xa   :  { %129 = vmatpush3.msra.mxu0 %v23_v5 }
   0xb   :  { %130 = vmatprep.subr.mxu0 %v157_v0 }
   0xc   :  { %131 = vmatpush3.msra.mxu0 %v22_v6 }
   0xd   :  { %132 = vmatprep.subr.mxu0 %v157_v0 }
   0xe   :  { %133 = vmatpush3.msra.mxu0 %v21_v7 }
   0xf   :  { %134 = vmatprep.subr.mxu0 %v157_v0 }
  0x10   :  { %135 = vmatpush3.msra.mxu0 %v20_v8 }
  0x11   :  { %136 = vmatprep.subr.mxu0 %v157_v0 }
  0x12   :  { %137 = vmatpush3.msra.mxu0 %v19_v9 }
  0x13   :  { %138 = vmatprep.subr.mxu0 %v157_v0 }
  0x14   :  { %139 = vmatpush3.msra.mxu0 %v18_v10 }
  0x15   :  { %140 = vmatprep.subr.mxu0 %v157_v0 }
  0x16   :  { %141 = vmatpush3.msra.mxu0 %v17_v11 }
  0x17   :  { %142 = vmatprep.subr.mxu0 %v157_v0 }
  0x18   :  { %143 = vmatpush3.msra.mxu0 %v16_v12 }
  0x19   :  { %144 = vmatprep.subr.mxu0 %v157_v0 }
  0x1a   :  { %145 = vmatpush3.msra.mxu0 %v15_v13 }
  0x1b   :  { %146 = vmatprep.subr.mxu0 %v157_v0 }
  0x1c   :  { %147 = vmatpush3.msra.mxu0 %v14_v14 }
  0x1d   :  { %148 = vmatprep.subr.mxu0 %v157_v0 }
  0x1e   :  { %149 = vmatpush3.msra.mxu0 %v13_v15 }
  0x1f   :  { %150 = vmatprep.subr.mxu0 %v157_v0 }
  0x20   :  { %151 = vmatpush3.msra.mxu0 %v12_v16 }
  0x21   :  { %153 = vmatmul.mubr.f32.vlgmr.msra.gmra.mxu0 %v11_v17 }
  0xe1   :  { %v94_v18 = vpop.f32.mrf.mxu0 }
  0xe2   :  { %98 = vst [vmem:[%s230_s2] sm:$0xff] %v94_v18 }
  0xe3   :  { %v154_v19 = vpop.f32.mrf.mxu0 }

</bundles_post_ra>
